<compile_context>
chip_gen: v6e
topology: v6e:2x2x1
jax: 0.10.0
libtpu: 0.0.40
codegen_flags: <defaults>
</compile_context>

<pallas_src>
import functools

import jax
import jax.numpy as jnp
from jax.experimental import pallas as pl
from jax.experimental.pallas import tpu as pltpu


def _mlp_kernel(x_ref, *refs, depth, matmul_dtype):
    """Fused MLP on one packed batch tile, fully resident in VMEM.

    refs = (w0, b0, w1, b1, ..., w_{depth-1}, b_{depth-1}, out_ref)
      w_i : (p*in_i, p*out_i)  block-diagonal, pre-transposed, matmul dtype
      b_i : (1, p*out_i)       float32
    """
    param_refs = refs[:-1]
    out_ref = refs[-1]

    h = x_ref[...].astype(jnp.float32)
    for i in range(depth):
        w = param_refs[2 * i][...]                 # already in matmul dtype
        b = param_refs[2 * i + 1][...]             # f32
        # MXU: bf16 operands (native on v6e/v7x), f32 accumulation.
        acc = jnp.dot(h.astype(matmul_dtype), w,
                      preferred_element_type=jnp.float32)
        h = acc + b                                # VPU, f32
        if i < depth - 1:                          # hidden layers: tanh
            h = jnp.tanh(h)                        # EUP, f32 (v5e-safe)
    out_ref[...] = h.astype(out_ref.dtype)


def dnn_forward(x, weights, biases, *, tm=256, matmul_dtype=jnp.bfloat16):
    """Run the fused, lane-packed MLP kernel.

    x       : (N, layers[0]) float32 (N may be ragged; it is padded internally)
    weights : PyTorch-convention weights, weights[i] shape (out_i, in_i)
    biases  : biases, biases[i] shape (out_i,)
    """
    x = jnp.asarray(x, jnp.float32)
    N, f_in = x.shape
    depth = len(weights)
    out_dim = int(weights[-1].shape[0])
    assert tm % 8 == 0

    # ---- lane-packing factor: pack p batch rows per vreg row so the widest
    # layer fills (close to) all 128 lanes.
    widths = [f_in] + [int(w.shape[0]) for w in weights]
    p = max(1, 128 // max(widths))
    p = 1 << (p.bit_length() - 1)              # power of two
    while p > 1 and tm % (8 * p) != 0:         # tm/p rows, multiple of 8 sublanes
        p //= 2

    # ---- pad the (possibly ragged) batch to a multiple of tm.
    n_pad = ((N + tm - 1) // tm) * tm
    if n_pad != N:
        x = jnp.pad(x, ((0, n_pad - N), (0, 0)))

    rows = n_pad // p                          # packed row count
    tile_rows = tm // p                        # packed rows per grid step
    x_packed = x.reshape(rows, p * f_in)       # row-major: p rows -> 1 packed row

    # ---- parameters: transpose to (in, out), block-diagonalize p-fold,
    # tile biases to p*out lanes, store weights in the matmul dtype.
    flat_params = []
    in_specs = [pl.BlockSpec((tile_rows, p * f_in), lambda i: (i, 0))]
    for w, b in zip(weights, biases):
        wt = jnp.asarray(w, jnp.float32).T                           # (in, out)
        wbd = jnp.kron(jnp.eye(p, dtype=wt.dtype), wt)               # (p*in, p*out)
        wbd = wbd.astype(matmul_dtype)
        bt = jnp.tile(jnp.asarray(b, jnp.float32).reshape(1, -1), (1, p))
        flat_params += [wbd, bt]
        # Whole-array blocks: parameters stay resident across all grid steps.
        # TODO(synk): pipeline_mode=pl.Buffered(1) would single-buffer these
        # constants; skipped because they are only a few KiB at these widths.
        in_specs.append(pl.BlockSpec(wbd.shape, lambda i: (0, 0)))
        in_specs.append(pl.BlockSpec(bt.shape, lambda i: (0, 0)))

    kernel = functools.partial(_mlp_kernel, depth=depth,
                               matmul_dtype=matmul_dtype)

    out_packed = pl.pallas_call(
        kernel,
        out_shape=jax.ShapeDtypeStruct((rows, p * out_dim), x.dtype),
        grid_spec=pltpu.PrefetchScalarGridSpec(
            num_scalar_prefetch=0,
            grid=(n_pad // tm,),
            in_specs=in_specs,
            out_specs=pl.BlockSpec((tile_rows, p * out_dim), lambda i: (i, 0)),
        ),
        compiler_params=pltpu.CompilerParams(
            # "parallel" lets the batch grid shard across v7x's two TensorCores.
            dimension_semantics=("parallel",),
            vmem_limit_bytes=32 * 1024 * 1024,
        ),
    )(x_packed, *flat_params)

    # Unpack lanes back to (N, out_dim); drop the padding rows.
    out = out_packed.reshape(n_pad, out_dim)
    return out[:N]


def init_dnn_params(key, layers):
    """Deterministic init matching nn.Linear shapes: W_i (out, in), b_i (out,)."""
    weights, biases = [], []
    for i in range(len(layers) - 1):
        fan_in, fan_out = layers[i], layers[i + 1]
        key, kw, kb = jax.random.split(key, 3)
        bound = 1.0 / jnp.sqrt(fan_in)
        weights.append(
            jax.random.uniform(kw, (fan_out, fan_in), jnp.float32, -bound, bound))
        biases.append(
            jax.random.uniform(kb, (fan_out,), jnp.float32, -bound, bound))
    return weights, biases


def dnn_reference(x, weights, biases, matmul_dtype=None):
    """Pure-JAX reference mirroring the PyTorch forward.

    If matmul_dtype is given, matmul operands are cast to it (f32 accumulate),
    matching the kernel's MXU semantics.
    """
    h = jnp.asarray(x, jnp.float32)
    depth = len(weights)
    for i, (w, b) in enumerate(zip(weights, biases)):
        wt = jnp.asarray(w, jnp.float32).T
        if matmul_dtype is not None:
            acc = jnp.dot(h.astype(matmul_dtype), wt.astype(matmul_dtype),
                          preferred_element_type=jnp.float32)
        else:
            acc = jnp.dot(h, wt, preferred_element_type=jnp.float32)
        h = acc + jnp.asarray(b, jnp.float32)
        if i < depth - 1:
            h = jnp.tanh(h)
    return h


if __name__ == "__main__":
    # Typical convection-PINN configuration: (x, t) -> u.
    layers = [2, 32, 32, 32, 1]
    N = 2000  # deliberately ragged (not a multiple of tm) to exercise padding

    key = jax.random.PRNGKey(0)
    key, kx = jax.random.split(key)
    x = jax.random.normal(kx, (N, layers[0]), dtype=jnp.float32)
    weights, biases = init_dnn_params(key, layers)

    out = dnn_forward(x, weights, biases, tm=256)
    out = jax.block_until_ready(out)
    assert out.shape == (N, layers[-1])

    # Matched-semantics reference (bf16 MXU operands, f32 accumulate): tight.
    ref_bf16 = dnn_reference(x, weights, biases, matmul_dtype=jnp.bfloat16)
    assert jnp.allclose(out, ref_bf16, atol=2e-3, rtol=2e-3), \
        "mismatch vs matched-precision reference"

    # Full-f32 reference: loose tolerance covers bf16 operand rounding.
    ref_f32 = dnn_reference(x, weights, biases)
    assert jnp.allclose(out, ref_f32, atol=5e-2, rtol=5e-2), \
        "mismatch vs f32 reference"

    print("KERNEL_OK")
</pallas_src>

<mosaic_0001>
module attributes {stable_mosaic.version = 11 : i64} {
  func.func @_mlp_kernel(%arg0: i32, %arg1: memref<64x8xf32, #tpu.memory_space<vmem>>, %arg2: memref<8x128xbf16, #tpu.memory_space<vmem>>, %arg3: memref<1x128xf32, #tpu.memory_space<vmem>>, %arg4: memref<128x128xbf16, #tpu.memory_space<vmem>>, %arg5: memref<1x128xf32, #tpu.memory_space<vmem>>, %arg6: memref<128x128xbf16, #tpu.memory_space<vmem>>, %arg7: memref<1x128xf32, #tpu.memory_space<vmem>>, %arg8: memref<128x4xbf16, #tpu.memory_space<vmem>>, %arg9: memref<1x4xf32, #tpu.memory_space<vmem>>, %arg10: memref<64x4xf32, #tpu.memory_space<vmem>>) attributes {dimension_semantics = [#tpu.dimension_semantics<parallel>], iteration_bounds = array<i64: 8>, scalar_prefetch = 0 : i64, scratch_operands = 0 : i64, tpu.core_type = #tpu.core_type<tc>, window_params = [{transform_indices = @transform_0, window_bounds = array<i64: 64, 8>}, {pipeline_mode = #tpu.pipeline_mode<synchronous>, transform_indices = @transform_1, window_bounds = array<i64: 8, 128>}, {pipeline_mode = #tpu.pipeline_mode<synchronous>, transform_indices = @transform_2, window_bounds = array<i64: 1, 128>}, {pipeline_mode = #tpu.pipeline_mode<synchronous>, transform_indices = @transform_3, window_bounds = array<i64: 128, 128>}, {pipeline_mode = #tpu.pipeline_mode<synchronous>, transform_indices = @transform_4, window_bounds = array<i64: 1, 128>}, {pipeline_mode = #tpu.pipeline_mode<synchronous>, transform_indices = @transform_5, window_bounds = array<i64: 128, 128>}, {pipeline_mode = #tpu.pipeline_mode<synchronous>, transform_indices = @transform_6, window_bounds = array<i64: 1, 128>}, {pipeline_mode = #tpu.pipeline_mode<synchronous>, transform_indices = @transform_7, window_bounds = array<i64: 128, 4>}, {pipeline_mode = #tpu.pipeline_mode<synchronous>, transform_indices = @transform_8, window_bounds = array<i64: 1, 4>}, {transform_indices = @transform_9, window_bounds = array<i64: 64, 4>}]} {
    %c0 = arith.constant 0 : index
    %c0_0 = arith.constant 0 : index
    %0 = vector.load %arg1[%c0, %c0_0] : memref<64x8xf32, #tpu.memory_space<vmem>>, vector<64x8xf32>
    %c0_1 = arith.constant 0 : index
    %c0_2 = arith.constant 0 : index
    %1 = vector.load %arg2[%c0_1, %c0_2] : memref<8x128xbf16, #tpu.memory_space<vmem>>, vector<8x128xbf16>
    %c0_3 = arith.constant 0 : index
    %c0_4 = arith.constant 0 : index
    %2 = vector.load %arg3[%c0_3, %c0_4] : memref<1x128xf32, #tpu.memory_space<vmem>>, vector<1x128xf32>
    %3 = arith.truncf %0 : vector<64x8xf32> to vector<64x8xbf16>
    %cst = arith.constant dense<0.000000e+00> : vector<64x128xf32>
    %4 = tpu.matmul %3, %1, %cst {dimension_numbers = #tpu.dot_dimension_numbers<[1], [0], [0], [1], [0, 0, 1, 1], [], []>} : vector<64x8xbf16>, vector<8x128xbf16>, vector<64x128xf32> -> vector<64x128xf32>
    %5 = vector.broadcast %2 : vector<1x128xf32> to vector<64x128xf32>
    %6 = arith.addf %4, %5 : vector<64x128xf32>
    %7 = math.tanh %6 : vector<64x128xf32>
    %c0_5 = arith.constant 0 : index
    %c0_6 = arith.constant 0 : index
    %8 = vector.load %arg4[%c0_5, %c0_6] : memref<128x128xbf16, #tpu.memory_space<vmem>>, vector<128x128xbf16>
    %c0_7 = arith.constant 0 : index
    %c0_8 = arith.constant 0 : index
    %9 = vector.load %arg5[%c0_7, %c0_8] : memref<1x128xf32, #tpu.memory_space<vmem>>, vector<1x128xf32>
    %10 = arith.truncf %7 : vector<64x128xf32> to vector<64x128xbf16>
    %cst_9 = arith.constant dense<0.000000e+00> : vector<64x128xf32>
    %11 = tpu.matmul %10, %8, %cst_9 {dimension_numbers = #tpu.dot_dimension_numbers<[1], [0], [0], [1], [0, 0, 1, 1], [], []>} : vector<64x128xbf16>, vector<128x128xbf16>, vector<64x128xf32> -> vector<64x128xf32>
    %12 = vector.broadcast %9 : vector<1x128xf32> to vector<64x128xf32>
    %13 = arith.addf %11, %12 : vector<64x128xf32>
    %14 = math.tanh %13 : vector<64x128xf32>
    %c0_10 = arith.constant 0 : index
    %c0_11 = arith.constant 0 : index
    %15 = vector.load %arg6[%c0_10, %c0_11] : memref<128x128xbf16, #tpu.memory_space<vmem>>, vector<128x128xbf16>
    %c0_12 = arith.constant 0 : index
    %c0_13 = arith.constant 0 : index
    %16 = vector.load %arg7[%c0_12, %c0_13] : memref<1x128xf32, #tpu.memory_space<vmem>>, vector<1x128xf32>
    %17 = arith.truncf %14 : vector<64x128xf32> to vector<64x128xbf16>
    %cst_14 = arith.constant dense<0.000000e+00> : vector<64x128xf32>
    %18 = tpu.matmul %17, %15, %cst_14 {dimension_numbers = #tpu.dot_dimension_numbers<[1], [0], [0], [1], [0, 0, 1, 1], [], []>} : vector<64x128xbf16>, vector<128x128xbf16>, vector<64x128xf32> -> vector<64x128xf32>
    %19 = vector.broadcast %16 : vector<1x128xf32> to vector<64x128xf32>
    %20 = arith.addf %18, %19 : vector<64x128xf32>
    %21 = math.tanh %20 : vector<64x128xf32>
    %c0_15 = arith.constant 0 : index
    %c0_16 = arith.constant 0 : index
    %22 = vector.load %arg8[%c0_15, %c0_16] : memref<128x4xbf16, #tpu.memory_space<vmem>>, vector<128x4xbf16>
    %c0_17 = arith.constant 0 : index
    %c0_18 = arith.constant 0 : index
    %23 = vector.load %arg9[%c0_17, %c0_18] : memref<1x4xf32, #tpu.memory_space<vmem>>, vector<1x4xf32>
    %24 = arith.truncf %21 : vector<64x128xf32> to vector<64x128xbf16>
    %cst_19 = arith.constant dense<0.000000e+00> : vector<64x4xf32>
    %25 = tpu.matmul %24, %22, %cst_19 {dimension_numbers = #tpu.dot_dimension_numbers<[1], [0], [0], [1], [0, 0, 1, 1], [], []>} : vector<64x128xbf16>, vector<128x4xbf16>, vector<64x4xf32> -> vector<64x4xf32>
    %26 = vector.broadcast %23 : vector<1x4xf32> to vector<64x4xf32>
    %27 = arith.addf %25, %26 : vector<64x4xf32>
    %c0_20 = arith.constant 0 : index
    %c0_21 = arith.constant 0 : index
    %28 = vector.load %arg10[%c0_20, %c0_21] : memref<64x4xf32, #tpu.memory_space<vmem>>, vector<64x4xf32>
    tpu.vector_store %arg10[%c0_20, %c0_21], %27 {strides = array<i32>} : memref<64x4xf32, #tpu.memory_space<vmem>>, vector<64x4xf32>,
    return
  }
  func.func @transform_0(%arg0: i32) -> (i32, i32) {
    %c0_i32 = arith.constant 0 : i32
    %c0_i32_0 = arith.constant 0 : i32
    return %arg0, %c0_i32 : i32, i32
  }
  func.func @transform_1(%arg0: i32) -> (i32, i32) {
    %c0_i32 = arith.constant 0 : i32
    %c0_i32_0 = arith.constant 0 : i32
    %c0_i32_1 = arith.constant 0 : i32
    return %c0_i32, %c0_i32_0 : i32, i32
  }
  func.func @transform_2(%arg0: i32) -> (i32, i32) {
    %c0_i32 = arith.constant 0 : i32
    %c0_i32_0 = arith.constant 0 : i32
    %c0_i32_1 = arith.constant 0 : i32
    return %c0_i32, %c0_i32_0 : i32, i32
  }
  func.func @transform_3(%arg0: i32) -> (i32, i32) {
    %c0_i32 = arith.constant 0 : i32
    %c0_i32_0 = arith.constant 0 : i32
    %c0_i32_1 = arith.constant 0 : i32
    return %c0_i32, %c0_i32_0 : i32, i32
  }
  func.func @transform_4(%arg0: i32) -> (i32, i32) {
    %c0_i32 = arith.constant 0 : i32
    %c0_i32_0 = arith.constant 0 : i32
    %c0_i32_1 = arith.constant 0 : i32
    return %c0_i32, %c0_i32_0 : i32, i32
  }
  func.func @transform_5(%arg0: i32) -> (i32, i32) {
    %c0_i32 = arith.constant 0 : i32
    %c0_i32_0 = arith.constant 0 : i32
    %c0_i32_1 = arith.constant 0 : i32
    return %c0_i32, %c0_i32_0 : i32, i32
  }
  func.func @transform_6(%arg0: i32) -> (i32, i32) {
    %c0_i32 = arith.constant 0 : i32
    %c0_i32_0 = arith.constant 0 : i32
    %c0_i32_1 = arith.constant 0 : i32
    return %c0_i32, %c0_i32_0 : i32, i32
  }
  func.func @transform_7(%arg0: i32) -> (i32, i32) {
    %c0_i32 = arith.constant 0 : i32
    %c0_i32_0 = arith.constant 0 : i32
    %c0_i32_1 = arith.constant 0 : i32
    return %c0_i32, %c0_i32_0 : i32, i32
  }
  func.func @transform_8(%arg0: i32) -> (i32, i32) {
    %c0_i32 = arith.constant 0 : i32
    %c0_i32_0 = arith.constant 0 : i32
    %c0_i32_1 = arith.constant 0 : i32
    return %c0_i32, %c0_i32_0 : i32, i32
  }
  func.func @transform_9(%arg0: i32) -> (i32, i32) {
    %c0_i32 = arith.constant 0 : i32
    %c0_i32_0 = arith.constant 0 : i32
    return %arg0, %c0_i32 : i32, i32
  }
}

</mosaic_0001>

<bundles_post_ra>
// kernel: tpu_custom_call.1
= control target key start
LH: loop header
LB: loop body
LE: loop exit
PB: predicated region body
PF: predicated region fallthrough
CT: control target
= control target key end

     0   :  { %s1269_s30 = smov 0   ;;  %s1388_s0 = inlined_call_operand.vmem [shape: f32[512,8], index: 0, kind: input, shape index: {}]   ;;  %s1389_s1 = inlined_call_operand.vmem [shape: bf16[8,128], index: 1, kind: input, shape index: {}]   ;;  %s1390_s2 = inlined_call_operand.vmem [shape: f32[1,128], index: 2, kind: input, shape index: {}]   ;;  %s1391_s3 = inlined_call_operand.vmem [shape: bf16[128,128], index: 3, kind: input, shape index: {}]   ;;  %s1392_s4 = inlined_call_operand.vmem [shape: f32[1,128], index: 4, kind: input, shape index: {}]   ;;  %s1393_s5 = inlined_call_operand.vmem [shape: bf16[128,128], index: 5, kind: input, shape index: {}]   ;;  %s1394_s6 = inlined_call_operand.vmem [shape: f32[1,128], index: 6, kind: input, shape index: {}]   ;;  %s1395_s7 = inlined_call_operand.vmem [shape: bf16[128,4], index: 7, kind: input, shape index: {}]   ;;  %s1396_s8 = inlined_call_operand.vmem [shape: f32[1,4], index: 8, kind: input, shape index: {}]   ;;  %s1397_s9 = inlined_call_operand.vmem [shape: f32[512,4], index: 9, kind: output, shape index: {}]  }
   0x1 LB: > { %s948_s10 = sadd.s32 4294967295, %s1217_s30   ;;  %p952_p0 = scmp.ge.s32.totalorder %s1217_s30, 1  ;;  %s1217_s30 = sphi %s1269_s30, %s19_s30  }
   0x2   : > { %p288_p1 = scmp.lt.s32.totalorder %s1217_s30, 9 }
   0x4   : > { %p289_p2 = pnand %p952_p0, %p288_p1 }
   0x5   : > { %s953_s13 = sshll.u32 (!%p289_p2), %s948_s10, 3 }
   0x6   : > { %292 = sbr.rel (%p289_p2) target bundleno = 882 (0x372), region = 56  ;;  %p325_p3 = scmp.lt.s32.totalorder (!%p289_p2), %s953_s13, 63 }
   0xb   : > { %v345_v0 = vld [vmem:[%s1389_s1] sm:$0xf]  ;;  %vm370_vm0 = vcmask 1043456   ;;  %v1139_v1 = vld [vmem:[%s1391_s3 + $0x38] sm:$0xff]   ;;  %v1140_v3 = vld [vmem:[%s1391_s3 + $0x30] sm:$0xff]   ;;  %s1399_s13 = smov (!%p325_p3, %s953_s13), 63 }
   0xc   : > { %1130 = vmatprep.subr.msk.bf16.mxu0 %vm370_vm0, %v345_v0  ;;  %v372_v2 = vsel %vm370_vm0, %v345_v0, 0  ;;  %1042 = vmatprep.subr.bf16.mxu1 %v1139_v1  ;;  %s954_s18 = sshll.u32 %s1399_s13, 3  ;;  %vm357_vm1 = vcmask 64512   ;;  %v1141_v16 = vld [vmem:[%s1391_s3 + $0x28] sm:$0xff]   ;;  %v1142_v17 = vld [vmem:[%s1391_s3 + $0x20] sm:$0xff]   ;;  %v1143_v18 = vld [vmem:[%s1391_s3 + $0x18] sm:$0xff]  }
   0xd   : > { %1033 = vmatpush3.bf16.msra.mxu0 %v372_v2  ;;  %1043 = vmatpush3.bf16.msra.mxu1 %v1139_v1  ;;  %s328_s21 = scalar_lea.vmem %s1388_s0, %s954_s18  ;;  %v1144_v19 = vld [vmem:[%s1391_s3 + $0x10] sm:$0xff]   ;;  %v1145_v20 = vld [vmem:[%s1391_s3 + $0x8] sm:$0xff]   ;;  %v1146_v21 = vld [vmem:[%s1391_s3] sm:$0xff]   ;;  %s334_s22 = scalar_lea.vmem %s1397_s9, %s954_s18  ;;  %vm883_vm2 = vcmask 31744  }
   0xe   : > { %1044 = vmatprep.subr.bf16.mxu1 %v1140_v3  ;;  %v337_v4 = vld [vmem:[%s328_s21] sm:$0xff]  ;;  %v338_v5 = vld [vmem:[%s328_s21 + $0x8] sm:$0xff]  ;;  %v339_v6 = vld [vmem:[%s328_s21 + $0x10] sm:$0xff] }
   0xf   : > { %v347_v7 = vpack.c.bf16 %v338_v5, %v337_v4  ;;  %v340_v8 = vld [vmem:[%s328_s21 + $0x18] sm:$0xff]  ;;  %v341_v9 = vld [vmem:[%s328_s21 + $0x20] sm:$0xff]  ;;  %v342_v10 = vld [vmem:[%s328_s21 + $0x28] sm:$0xff] }
  0x10   : > { %v348_v11 = vpack.c.bf16 %v340_v8, %v339_v6  ;;  %v349_v12 = vpack.c.bf16 %v342_v10, %v341_v9  ;;  %v343_v13 = vld [vmem:[%s328_s21 + $0x30] sm:$0xff]  ;;  %v344_v14 = vld [vmem:[%s328_s21 + $0x38] sm:$0xff]  ;;  %v957_v25 = vld [vmem:[%s1390_s2] ss:$0 sm:$0xff] }
  0x11   : > { %1045 = vmatpush3.bf16.msra.mxu1 %v1140_v3  ;;  %1034 = vmatprep.mubr.msk.bf16.mxu0 %vm357_vm1, %v347_v7  ;;  %v350_v15 = vpack.c.bf16 %v344_v14, %v343_v13  ;;  %v1147_v22 = vld [vmem:[%s1393_s5 + $0x38] sm:$0xff]   ;;  %v1148_v23 = vld [vmem:[%s1393_s5 + $0x30] sm:$0xff]   ;;  %v1149_v53 = vld [vmem:[%s1393_s5 + $0x28] sm:$0xff]  }
  0x12   : > { %1035 = vmatmul.mubr.msk.bf16.vlgmr.msra.gmra.mxu0 %vm357_vm1, %v348_v11  ;;  %1046 = vmatprep.subr.bf16.mxu1 %v1141_v16  ;;  %v1150_v54 = vld [vmem:[%s1393_s5 + $0x20] sm:$0xff]   ;;  %v1151_v55 = vld [vmem:[%s1393_s5 + $0x18] sm:$0xff]   ;;  %v1152_v56 = vld [vmem:[%s1393_s5 + $0x10] sm:$0xff]  }
  0x13   : > { %1038 = vmatprep.mubr.msk.bf16.mxu0 %vm357_vm1, %v349_v12  ;;  %1066 = vmatprep.subr.bf16.mxu0 %v1147_v22  ;;  %v1153_v57 = vld [vmem:[%s1393_s5 + $0x8] sm:$0xff]   ;;  %v1154_v58 = vld [vmem:[%s1393_s5] sm:$0xff]   ;;  %v1155_v59 = vld [vmem:[%s1395_s7 + $0x38] sm:$0xff]  }
  0x14   : > { %1067 = vmatpush3.bf16.msra.mxu0 %v1147_v22  ;;  %v1156_v60 = vld [vmem:[%s1395_s7 + $0x30] sm:$0xff]   ;;  %v962_v62 = vld [vmem:[%s1392_s4] ss:$0 sm:$0xff] }
  0x15   : > { %1047 = vmatpush3.bf16.msra.mxu1 %v1141_v16  ;;  %1068 = vmatprep.subr.bf16.mxu0 %v1148_v23 }
  0x16   : > { %1048 = vmatprep.subr.bf16.mxu1 %v1142_v17 }
  0x18   : > { %1069 = vmatpush3.bf16.msra.mxu0 %v1148_v23 }
  0x19   : > { %1049 = vmatpush3.bf16.msra.mxu1 %v1142_v17  ;;  %1070 = vmatprep.subr.bf16.mxu0 %v1149_v53 }
  0x1a   : > { %1039 = vmatmul.mubr.msk.bf16.gmra.mxu0 %vm357_vm1, %v350_v15  ;;  %1050 = vmatprep.subr.bf16.mxu1 %v1143_v18 }
  0x1c   : > { %1071 = vmatpush3.bf16.msra.mxu0 %v1149_v53 }
  0x1d   : > { %1051 = vmatpush3.bf16.msra.mxu1 %v1143_v18  ;;  %1072 = vmatprep.subr.bf16.mxu0 %v1150_v54 }
  0x1e   : > { %1052 = vmatprep.subr.bf16.mxu1 %v1144_v19 }
  0x20   : > { %1073 = vmatpush3.bf16.msra.mxu0 %v1150_v54 }
  0x21   : > { %1053 = vmatpush3.bf16.msra.mxu1 %v1144_v19  ;;  %1074 = vmatprep.subr.bf16.mxu0 %v1151_v55 }
  0x22   : > { %1054 = vmatprep.subr.bf16.mxu1 %v1145_v20 }
  0x24   : > { %1075 = vmatpush3.bf16.msra.mxu0 %v1151_v55 }
  0x25   : > { %1055 = vmatpush3.bf16.msra.mxu1 %v1145_v20  ;;  %1076 = vmatprep.subr.bf16.mxu0 %v1152_v56 }
  0x26   : > { %1056 = vmatprep.subr.bf16.mxu1 %v1146_v21 }
  0x28   : > { %1077 = vmatpush3.bf16.msra.mxu0 %v1152_v56 }
  0x29   : > { %1057 = vmatpush3.bf16.msra.mxu1 %v1146_v21  ;;  %1078 = vmatprep.subr.bf16.mxu0 %v1153_v57 }
  0x2a   : > { %1114 = vmatprep.subr.bf16.mxu1 %v1155_v59 }
  0x2c   : > { %1079 = vmatpush3.bf16.msra.mxu0 %v1153_v57 }
  0x2d   : > { %1080 = vmatprep.subr.bf16.mxu0 %v1154_v58 }
  0x30   : > { %1081 = vmatpush3.bf16.msra.mxu0 %v1154_v58 }
  0x31   : > { %1090 = vmatprep.subr.bf16.mxu0 %v1155_v59 }
  0xd2   : > { %v1036_v24 = vpop.f32.mrf.mxu0 }
  0xd3   : > { %v417_v30 = vadd.f32 %v1036_v24, %v957_v25 }
  0xd4   : > { %v408_v26 = vpop.f32.mrf.mxu0 }
  0xd5   : > { %v409_v27 = vadd.f32 %v957_v25, %v408_v26  ;;  %v1157_v26 = vld [vmem:[%s1395_s7 + $0x28] sm:$0xff]  }
  0xd6   : > { %v1037_v28 = vpop.f32.mrf.mxu0 }
  0xd7   : > { %v420_v29 = vadd.f32 %v1037_v28, %v957_v25  ;;  %1163 = vtanh.f32 %v409_v27  ;;  %v1158_v27 = vld [vmem:[%s1395_s7 + $0x20] sm:$0xff]   ;;  %v1159_v28 = vld [vmem:[%s1395_s7 + $0x18] sm:$0xff]  }
  0xd8   : > { %v411_v31 = vpop.f32.mrf.mxu0 }
  0xd9   : > { %v412_v32 = vadd.f32 %v957_v25, %v411_v31  ;;  %1165 = vtanh.f32 %v420_v29  ;;  %v1160_v29 = vld [vmem:[%s1395_s7 + $0x10] sm:$0xff]   ;;  %v1162_v31 = vld [vmem:[%s1395_s7] sm:$0xff]  }
  0xda   : > { %v1040_v33 = vpop.f32.mrf.mxu0 }
  0xdb   : > { %1167 = vtanh.f32 %v412_v32  ;;  %v433_v38 = vadd.f32 %v1040_v33, %v957_v25  ;;  %v971_v33 = vld [vmem:[%s1394_s6] ss:$0 sm:$0xff] }
  0xdc   : > { %1169 = vtanh.f32 %v417_v30  ;;  %v424_v34 = vpop.f32.mrf.mxu0  ;;  %v1161_v30 = vld [vmem:[%s1395_s7 + $0x8] sm:$0xff]  }
  0xdd   : > { %v425_v35 = vadd.f32 %v957_v25, %v424_v34 }
  0xde   : > { %v1041_v36 = vpop.f32.mrf.mxu0 }
  0xdf   : > { %v436_v37 = vadd.f32 %v1041_v36, %v957_v25  ;;  %1171 = vtanh.f32 %v425_v35 }
  0xe0   : > { %v427_v39 = vpop.f32.mrf.mxu0 }
  0xe1   : > { %v428_v40 = vadd.f32 %v957_v25, %v427_v39  ;;  %1173 = vtanh.f32 %v436_v37 }
  0xe3   : > { %1175 = vtanh.f32 %v428_v40 }
  0xe4   : > { %1177 = vtanh.f32 %v433_v38  ;;  %v1164_v41 = vpop.eup %1163 }
  0xe6   : > { %v1166_v42 = vpop.eup %1165 }
  0xe8   : > { %v1168_v43 = vpop.eup %1167 }
  0xe9   : > { %v1170_v44 = vpop.eup %1169  ;;  %v464_v45 = vpack.c.bf16 %v1168_v43, %v1164_v41 }
  0xea   : > { %v465_v46 = vpack.c.bf16 %v1166_v42, %v1170_v44 }
  0xeb   : > { %1058 = vmatprep.mubr.bf16.mxu1 %v464_v45 }
  0xec   : > { %1059 = vmatmul.mubr.bf16.vlgmr.msra.gmra.mxu1 %v465_v46  ;;  %v1172_v47 = vpop.eup %1171 }
  0xed   : > { %1122 = vmatpush3.bf16.msra.mxu1 %v1155_v59 }
  0xee   : > { %v1174_v48 = vpop.eup %1173  ;;  %1115 = vmatprep.subr.bf16.mxu1 %v1156_v60 }
  0xf0   : > { %v1176_v49 = vpop.eup %1175 }
  0xf1   : > { %v1178_v50 = vpop.eup %1177  ;;  %v466_v51 = vpack.c.bf16 %v1176_v49, %v1172_v47  ;;  %1123 = vmatpush3.bf16.msra.mxu1 %v1156_v60 }
  0xf2   : > { %v467_v52 = vpack.c.bf16 %v1174_v48, %v1178_v50  ;;  %1116 = vmatprep.subr.bf16.mxu1 %v1157_v26 }
  0xf3   : > { %1062 = vmatprep.mubr.bf16.mxu1 %v466_v51 }
  0xf4   : > { %1063 = vmatmul.mubr.bf16.gmra.mxu1 %v467_v52 }
  0xf5   : > { %1124 = vmatpush3.bf16.msra.mxu1 %v1157_v26 }
  0xf6   : > { %1117 = vmatprep.subr.bf16.mxu1 %v1158_v27 }
  0xf9   : > { %1125 = vmatpush3.bf16.msra.mxu1 %v1158_v27 }
  0xfa   : > { %1118 = vmatprep.subr.bf16.mxu1 %v1159_v28 }
  0xfd   : > { %1126 = vmatpush3.bf16.msra.mxu1 %v1159_v28 }
  0xfe   : > { %1119 = vmatprep.subr.bf16.mxu1 %v1160_v29 }
 0x101   : > { %1127 = vmatpush3.bf16.msra.mxu1 %v1160_v29 }
 0x102   : > { %1120 = vmatprep.subr.bf16.mxu1 %v1161_v30 }
 0x105   : > { %1128 = vmatpush3.bf16.msra.mxu1 %v1161_v30 }
 0x106   : > { %1121 = vmatprep.subr.bf16.mxu1 %v1162_v31 }
 0x109   : > { %1129 = vmatpush3.bf16.msra.mxu1 %v1162_v31 }
 0x1ac   : > { %v1060_v61 = vpop.f32.mrf.mxu1 }
 0x1ad   : > { %v565_v3 = vadd.f32 %v1060_v61, %v962_v62  ;;  %v980_v61 = vld [vmem:[%s1396_s8] ss:$0 sm:$0xff] }
 0x1ae   : > { %v556_v63 = vpop.f32.mrf.mxu1 }
 0x1af   : > { %v557_v0 = vadd.f32 %v962_v62, %v556_v63 }
 0x1b0   : > { %v1061_v1 = vpop.f32.mrf.mxu1 }
 0x1b1   : > { %v568_v2 = vadd.f32 %v1061_v1, %v962_v62  ;;  %1179 = vtanh.f32 %v557_v0 }
 0x1b2   : > { %v559_v4 = vpop.f32.mrf.mxu1 }
 0x1b3   : > { %v560_v5 = vadd.f32 %v962_v62, %v559_v4  ;;  %1181 = vtanh.f32 %v568_v2 }
 0x1b4   : > { %v1064_v6 = vpop.f32.mrf.mxu1 }
 0x1b5   : > { %1183 = vtanh.f32 %v560_v5  ;;  %v581_v11 = vadd.f32 %v1064_v6, %v962_v62 }
 0x1b6   : > { %1185 = vtanh.f32 %v565_v3  ;;  %v572_v7 = vpop.f32.mrf.mxu1 }
 0x1b7   : > { %v573_v8 = vadd.f32 %v962_v62, %v572_v7 }
 0x1b8   : > { %v1065_v9 = vpop.f32.mrf.mxu1 }
 0x1b9   : > { %v584_v10 = vadd.f32 %v1065_v9, %v962_v62  ;;  %1187 = vtanh.f32 %v573_v8 }
 0x1ba   : > { %v575_v12 = vpop.f32.mrf.mxu1 }
 0x1bb   : > { %v576_v13 = vadd.f32 %v962_v62, %v575_v12  ;;  %1189 = vtanh.f32 %v584_v10 }
 0x1bd   : > { %1191 = vtanh.f32 %v576_v13 }
 0x1be   : > { %1193 = vtanh.f32 %v581_v11  ;;  %v1180_v14 = vpop.eup %1179 }
 0x1c0   : > { %v1182_v15 = vpop.eup %1181 }
 0x1c2   : > { %v1184_v16 = vpop.eup %1183 }
 0x1c3   : > { %v1186_v17 = vpop.eup %1185  ;;  %v612_v18 = vpack.c.bf16 %v1184_v16, %v1180_v14 }
 0x1c4   : > { %v613_v19 = vpack.c.bf16 %v1182_v15, %v1186_v17 }
 0x1c5   : > { %1082 = vmatprep.mubr.bf16.mxu0 %v612_v18 }
 0x1c6   : > { %1083 = vmatmul.mubr.bf16.vlgmr.msra.gmra.mxu0 %v613_v19  ;;  %v1188_v20 = vpop.eup %1187 }
 0x1c7   : > { %1091 = vmatpush3.bf16.msra.mxu0 %v1155_v59 }
 0x1c8   : > { %1092 = vmatprep.subr.bf16.mxu0 %v1156_v60  ;;  %v1190_v21 = vpop.eup %1189 }
 0x1ca   : > { %v1192_v22 = vpop.eup %1191 }
 0x1cb   : > { %v1194_v23 = vpop.eup %1193  ;;  %v614_v24 = vpack.c.bf16 %v1192_v22, %v1188_v20  ;;  %1093 = vmatpush3.bf16.msra.mxu0 %v1156_v60 }
 0x1cc   : > { %v615_v25 = vpack.c.bf16 %v1190_v21, %v1194_v23  ;;  %1094 = vmatprep.subr.bf16.mxu0 %v1157_v26 }
 0x1cd   : > { %1086 = vmatprep.mubr.bf16.mxu0 %v614_v24 }
 0x1ce   : > { %1087 = vmatmul.mubr.bf16.gmra.mxu0 %v615_v25 }
 0x1cf   : > { %1095 = vmatpush3.bf16.msra.mxu0 %v1157_v26 }
 0x1d0   : > { %1096 = vmatprep.subr.bf16.mxu0 %v1158_v27 }
 0x1d3   : > { %1097 = vmatpush3.bf16.msra.mxu0 %v1158_v27 }
 0x1d4   : > { %1098 = vmatprep.subr.bf16.mxu0 %v1159_v28 }
 0x1d7   : > { %1099 = vmatpush3.bf16.msra.mxu0 %v1159_v28 }
 0x1d8   : > { %1100 = vmatprep.subr.bf16.mxu0 %v1160_v29 }
 0x1db   : > { %1101 = vmatpush3.bf16.msra.mxu0 %v1160_v29 }
 0x1dc   : > { %1102 = vmatprep.subr.bf16.mxu0 %v1161_v30 }
 0x1df   : > { %1103 = vmatpush3.bf16.msra.mxu0 %v1161_v30 }
 0x1e0   : > { %1104 = vmatprep.subr.bf16.mxu0 %v1162_v31 }
 0x1e3   : > { %1105 = vmatpush3.bf16.msra.mxu0 %v1162_v31 }
 0x286   : > { %v1084_v32 = vpop.f32.mrf.mxu0 }
 0x287   : > { %v713_v38 = vadd.f32 %v1084_v32, %v971_v33 }
 0x288   : > { %v704_v34 = vpop.f32.mrf.mxu0 }
 0x289   : > { %v705_v35 = vadd.f32 %v971_v33, %v704_v34 }
 0x28a   : > { %v1085_v36 = vpop.f32.mrf.mxu0 }
 0x28b   : > { %v716_v37 = vadd.f32 %v1085_v36, %v971_v33  ;;  %1195 = vtanh.f32 %v705_v35 }
 0x28c   : > { %v707_v39 = vpop.f32.mrf.mxu0 }
 0x28d   : > { %v708_v40 = vadd.f32 %v971_v33, %v707_v39  ;;  %1197 = vtanh.f32 %v716_v37 }
 0x28e   : > { %v1088_v41 = vpop.f32.mrf.mxu0 }
 0x28f   : > { %1199 = vtanh.f32 %v708_v40  ;;  %v729_v46 = vadd.f32 %v1088_v41, %v971_v33 }
 0x290   : > { %1201 = vtanh.f32 %v713_v38  ;;  %v720_v42 = vpop.f32.mrf.mxu0 }
 0x291   : > { %v721_v43 = vadd.f32 %v971_v33, %v720_v42 }
 0x292   : > { %v1089_v44 = vpop.f32.mrf.mxu0 }
 0x293   : > { %v732_v45 = vadd.f32 %v1089_v44, %v971_v33  ;;  %1203 = vtanh.f32 %v721_v43 }
 0x294   : > { %v723_v47 = vpop.f32.mrf.mxu0 }
 0x295   : > { %v724_v48 = vadd.f32 %v971_v33, %v723_v47  ;;  %1205 = vtanh.f32 %v732_v45 }
 0x297   : > { %1207 = vtanh.f32 %v724_v48 }
 0x298   : > { %1209 = vtanh.f32 %v729_v46  ;;  %v1196_v49 = vpop.eup %1195 }
 0x29a   : > { %v1198_v50 = vpop.eup %1197 }
 0x29c   : > { %v1200_v51 = vpop.eup %1199 }
 0x29d   : > { %v1202_v52 = vpop.eup %1201  ;;  %v760_v53 = vpack.c.bf16 %v1200_v51, %v1196_v49 }
 0x29e   : > { %v761_v54 = vpack.c.bf16 %v1198_v50, %v1202_v52 }
 0x29f   : > { %1106 = vmatprep.mubr.bf16.mxu0 %v760_v53 }
 0x2a0   : > { %1107 = vmatmul.mubr.bf16.vlgmr.msra.gmra.mxu0 %v761_v54  ;;  %v1204_v55 = vpop.eup %1203 }
 0x2a2   : > { %v1206_v56 = vpop.eup %1205 }
 0x2a4   : > { %v1208_v57 = vpop.eup %1207 }
 0x2a5   : > { %v1210_v58 = vpop.eup %1209  ;;  %v762_v59 = vpack.c.bf16 %v1208_v57, %v1204_v55 }
 0x2a6   : > { %v763_v60 = vpack.c.bf16 %v1206_v56, %v1210_v58 }
 0x2a7   : > { %1110 = vmatprep.mubr.bf16.mxu1 %v762_v59 }
 0x2a8   : > { %1111 = vmatmul.mubr.bf16.vlgmr.msra.gmra.mxu1 %v763_v60 }
 0x360   : > { %v1108_v62 = vpop.f32.mrf.mxu0 }
 0x361   : > { %v861_v63 = vadd.f32 %v1108_v62, %v980_v61 }
 0x362   : > { %v852_v0 = vpop.f32.mrf.mxu0 }
 0x363   : > { %886 = vst.msk [vmem:[%s334_s22 + $0x10] sm:$0xff] %vm883_vm2, %v861_v63  ;;  %v853_v1 = vadd.f32 %v980_v61, %v852_v0 }
 0x364   : > { %v1109_v2 = vpop.f32.mrf.mxu0 }
 0x365   : > { %884 = vst.msk [vmem:[%s334_s22] sm:$0xff] %vm883_vm2, %v853_v1  ;;  %v864_v3 = vadd.f32 %v1109_v2, %v980_v61 }
 0x366   : > { %v855_v4 = vpop.f32.mrf.mxu0 }
 0x367   : > { %887 = vst.msk [vmem:[%s334_s22 + $0x18] sm:$0xff] %vm883_vm2, %v864_v3  ;;  %v856_v5 = vadd.f32 %v980_v61, %v855_v4 }
 0x368   : > { %v1112_v6 = vpop.f32.mrf.mxu1 }
 0x369   : > { %885 = vst.msk [vmem:[%s334_s22 + $0x8] sm:$0xff] %vm883_vm2, %v856_v5  ;;  %v877_v7 = vadd.f32 %v1112_v6, %v980_v61 }
 0x36a   : > { %v868_v8 = vpop.f32.mrf.mxu1 }
 0x36b   : > { %890 = vst.msk [vmem:[%s334_s22 + $0x30] sm:$0xff] %vm883_vm2, %v877_v7  ;;  %v869_v9 = vadd.f32 %v980_v61, %v868_v8 }
 0x36c   : > { %v1113_v10 = vpop.f32.mrf.mxu1 }
 0x36d   : > { %888 = vst.msk [vmem:[%s334_s22 + $0x20] sm:$0xff] %vm883_vm2, %v869_v9  ;;  %v880_v11 = vadd.f32 %v1113_v10, %v980_v61 }
 0x36e   : > { %v871_v12 = vpop.f32.mrf.mxu1 }
 0x36f   : > { %891 = vst.msk [vmem:[%s334_s22 + $0x38] sm:$0xff] %vm883_vm2, %v880_v11  ;;  %v872_v13 = vadd.f32 %v980_v61, %v871_v12 }
 0x371   : > { %889 = vst.msk [vmem:[%s334_s22 + $0x28] sm:$0xff] %vm883_vm2, %v872_v13 }
 0x372 PF: > { %s19_s30 = sadd.s32 1, %s1217_s30  }
 0x373   : > { %p16_p4 = scmp.ge.s32.totalorder %s19_s30, 10  }
 0x375   :  { %18 = sbr.rel (!%p16_p4) target bundleno = 1 (0x1), region = 86 }

</bundles_post_ra>
